<compile_context>
chip_gen: v6e
topology: v6e:2x2x1
jax: 0.10.0
libtpu: 0.0.40
codegen_flags: <defaults>
</compile_context>

<pallas_src>
import functools
import math

import jax
import jax.numpy as jnp
from jax import lax
from jax.experimental import pallas as pl
from jax.experimental.pallas import tpu as pltpu


def _neighbor_agg_kernel(q_ref, k_ref, q_w_ref, k_w_ref, v_w_ref, o_ref, *,
                         mxu_dtype=None):
    # Block shapes: q_ref (BB, Lq, E), k_ref (BB, Lk, E),
    #               q_w/k_w/v_w (E, H), o_ref (BB, Lq, H).
    BB, Lq, E = q_ref.shape
    _, Lk, _ = k_ref.shape
    H = q_w_ref.shape[1]

    # Flatten batch into the matmul M dimension: one MXU-sized matmul per
    # projection instead of BB tiny ones (sublane-only reshape, no lane move).
    q_flat = q_ref[...].reshape(BB * Lq, E)
    k_flat = k_ref[...].reshape(BB * Lk, E)
    q_w = q_w_ref[...]
    k_w = k_w_ref[...]
    v_w = v_w_ref[...]

    if mxu_dtype is not None:
        # In-kernel VPU cast of the MXU operands (no extra HBM pass in the
        # wrapper); accumulation and softmax stay f32.
        q_flat = q_flat.astype(mxu_dtype)
        k_flat = k_flat.astype(mxu_dtype)
        q_w = q_w.astype(mxu_dtype)
        k_w = k_w.astype(mxu_dtype)
        v_w = v_w.astype(mxu_dtype)

    # Three separate N=H projections (no Q|V fusion): avoids the lane-offset-32
    # split of a fused (., 2H) result, which would force XLU lane relayouts.
    # The MXU has huge slack at these sizes; lanes do not.
    trans_q = jnp.dot(q_flat, q_w,
                      preferred_element_type=jnp.float32).reshape(BB, Lq, H)
    trans_v = jnp.dot(q_flat, v_w,
                      preferred_element_type=jnp.float32).reshape(BB, Lq, H)
    trans_k = jnp.dot(k_flat, k_w,
                      preferred_element_type=jnp.float32).reshape(BB, Lk, H)

    # Batched contraction over the shared H axis (no explicit K transpose).
    # 1/sqrt(H) is already folded into q_w by the wrapper.
    logits = lax.dot_general(
        trans_q, trans_k,
        dimension_numbers=(((2,), (2,)), ((0,), (0,))),
        preferred_element_type=jnp.float32)                     # (BB, Lq, Lk)

    # Numerically-stable softmax over the last axis (f32 throughout).
    m = jnp.max(logits, axis=-1, keepdims=True)
    e = jnp.exp(logits - m)
    denom = jnp.sum(e, axis=-1, keepdims=True)
    # Exact reciprocal keeps the f32 path within the 1e-5 reference tolerance.
    score = e * pl.reciprocal(denom, approx=False)              # (BB, Lq, Lk)

    # Elementwise multiply (Lk == H in MacGNN's usage); store directly in the
    # natural (BB, Lq, H) layout -- at this output size the masked 32-lane
    # stores are cheaper than a sublane->lane relayout to a lane-dense slab.
    o_ref[...] = (trans_v * score).astype(o_ref.dtype)


def _tpu_generation_params():
    """Best-effort TPU generation detection with conservative fallbacks.

    Returns (physical_vmem_bytes_per_core, num_tensorcores_per_chip, mxu_rows).
    """
    vmem_bytes = 64 << 20     # smallest in the fleet (v7x physical VMEM / TC)
    num_tc = 1
    mxu_rows = 128
    try:
        kind = jax.devices()[0].device_kind.lower()
    except Exception:
        kind = ""
    if "v7" in kind:
        vmem_bytes, num_tc, mxu_rows = 64 << 20, 2, 256
    elif "v6" in kind:
        vmem_bytes, num_tc, mxu_rows = 128 << 20, 1, 256
    elif "v5" in kind:
        vmem_bytes, num_tc, mxu_rows = 128 << 20, 1, 128
    try:  # refine physical VMEM if the query API is available
        cap = getattr(pltpu.get_tpu_info(), "vmem_capacity_bytes", None)
        if cap:
            vmem_bytes = int(cap)
    except Exception:
        pass
    return vmem_bytes, num_tc, mxu_rows


def _choose_batch_block(B, Lq, Lk, E, H, act_itemsize, out_itemsize,
                        vmem_budget_bytes, num_tensorcores, mxu_rows):
    """Pick a batch block BB (divisor of B), generation-aware.

    * single-TC chips (v5e/v6e): largest divisor under the VMEM budget --
      fewer grid steps = less ~0.35 us/step overhead and bigger MXU fill.
    * v7x (2 TCs): keep >= 2 grid steps only if each step still feeds the MXU
      with >= mxu_rows projection rows; otherwise fall back to one step.
    * The VMEM model covers the double-buffered pipelined blocks AND the
      in-kernel f32 intermediates (trans_q/v/k, logits, score).
    """
    def step_bytes(bb):
        acts = bb * (Lq + Lk) * E * act_itemsize          # query + key blocks
        out = bb * Lq * H * out_itemsize                  # output block
        weights = 3 * E * H * act_itemsize                # Q/K/V weights
        pipelined = 2 * (acts + out + weights)            # double-buffered
        interm = bb * (3 * Lq * H + Lk * H + 2 * Lq * Lk) * 4   # f32 temps
        return pipelined + interm

    divisors = [d for d in range(1, B + 1) if B % d == 0]
    fits = [d for d in divisors if step_bytes(d) <= vmem_budget_bytes] or [1]

    if num_tensorcores >= 2:
        # Only worth sharding across TCs if every step still fills the MXU.
        cand = [d for d in fits
                if B // d >= num_tensorcores and d * Lq >= mxu_rows]
        if cand:
            return max(cand)
    return max(fits)


def neighbor_aggregation(query, key, q_w, k_w, v_w, *,
                         batch_block=None, mxu_dtype=None):
    """query: (B, Lq, E), key: (B, Lk, E), weights: (E, H) (already transposed
    vs. nn.Linear). Requires Lk == H (MacGNN's torch.mul broadcast).

    mxu_dtype: optional narrower MXU operand dtype (e.g. jnp.bfloat16); the
    cast happens inside the kernel (VPU), accumulation/softmax stay f32.
    """
    B, Lq, E = query.shape
    _, Lk, _ = key.shape
    H = q_w.shape[1]
    assert Lk == H, "torch.mul broadcast in the reference requires Lk == hidden_dim"

    out_dtype = query.dtype
    # Fold 1/sqrt(H) into the Q weight (one-time transform of a tiny constant)
    # so the kernel skips a VPU multiply over the (BB, Lq, Lk) logits per step.
    q_w_scaled = q_w * jnp.asarray(1.0 / math.sqrt(H), q_w.dtype)

    vmem_bytes, num_tc, mxu_rows = _tpu_generation_params()
    # Conservative budget: half of physical, capped at 48 MiB
    # (=> ~32 MiB on v7x, 48 MiB on v5e/v6e).
    vmem_budget = min(vmem_bytes // 2, 48 << 20)

    act_itemsize = jnp.dtype(query.dtype).itemsize
    out_itemsize = jnp.dtype(out_dtype).itemsize
    if batch_block is None:
        batch_block = _choose_batch_block(B, Lq, Lk, E, H,
                                          act_itemsize, out_itemsize,
                                          vmem_budget, num_tc, mxu_rows)
    BB = batch_block
    assert B % BB == 0, "batch_block must divide the batch size"
    n_steps = B // BB

    grid_spec = pltpu.PrefetchScalarGridSpec(
        num_scalar_prefetch=0,
        grid=(n_steps,),
        in_specs=[
            pl.BlockSpec((BB, Lq, E), lambda b: (b, 0, 0)),   # query block
            pl.BlockSpec((BB, Lk, E), lambda b: (b, 0, 0)),   # key block
            # Grid-invariant weights, full-array blocks.
            # TODO(synk): at large E/H on v7x, single-buffer these
            # (pipeline_mode=pl.Buffered(1)) to reclaim double-buffer VMEM.
            pl.BlockSpec((E, H), lambda b: (0, 0)),           # Q weight (scaled)
            pl.BlockSpec((E, H), lambda b: (0, 0)),           # K weight
            pl.BlockSpec((E, H), lambda b: (0, 0)),           # V weight
        ],
        # Natural-layout output block; last two block dims equal the full
        # array dims, so the (8, 128) rule is satisfied.
        out_specs=pl.BlockSpec((BB, Lq, H), lambda b: (b, 0, 0)),
    )

    kernel = functools.partial(_neighbor_agg_kernel, mxu_dtype=mxu_dtype)
    return pl.pallas_call(
        kernel,
        out_shape=jax.ShapeDtypeStruct((B, Lq, H), out_dtype),
        grid_spec=grid_spec,
        compiler_params=pltpu.CompilerParams(
            dimension_semantics=("parallel",),
            vmem_limit_bytes=int(vmem_budget)),
    )(query, key, q_w_scaled, k_w, v_w)


def neighbor_aggregation_ref(query, key, q_w, k_w, v_w):
    """Pure-JAX reference matching the PyTorch forward."""
    trans_q = jnp.einsum("ble,eh->blh", query, q_w)
    trans_k = jnp.einsum("ble,eh->blh", key, k_w)
    trans_v = jnp.einsum("ble,eh->blh", query, v_w)
    scale = 1.0 / math.sqrt(q_w.shape[1])
    logits = jnp.einsum("bqh,bkh->bqk", trans_q, trans_k) * scale
    score = jax.nn.softmax(logits, axis=-1)
    return trans_v * score


if __name__ == "__main__":
    # Small shapes consistent with the module: embed_dim = hidden_dim = 32,
    # batch = 8, Lq = 8 query rows, Lk = hidden_dim = 32 "neighbor" rows
    # (MacGNN uses Lk == hidden_dim so the final elementwise mul broadcasts).
    B, Lq, E, H = 8, 8, 32, 32
    Lk = H

    root = jax.random.PRNGKey(0)
    kq, kk, kw1, kw2, kw3 = jax.random.split(root, 5)

    query = jax.random.normal(kq, (B, Lq, E), dtype=jnp.float32)
    key_t = jax.random.normal(kk, (B, Lk, E), dtype=jnp.float32)

    # Deterministic nn.Linear-like init, stored already transposed as (E, H).
    bound = 1.0 / math.sqrt(E)
    q_w = jax.random.uniform(kw1, (E, H), jnp.float32, -bound, bound)
    k_w = jax.random.uniform(kw2, (E, H), jnp.float32, -bound, bound)
    v_w = jax.random.uniform(kw3, (E, H), jnp.float32, -bound, bound)

    ref = neighbor_aggregation_ref(query, key_t, q_w, k_w, v_w)

    # f32 MXU operands: exact-ish path.
    out = jax.block_until_ready(
        neighbor_aggregation(query, key_t, q_w, k_w, v_w))
    assert out.shape == (B, Lq, H)
    assert jnp.allclose(out, ref, atol=1e-5, rtol=1e-5)

    # bf16 MXU operands (in-kernel cast), f32 accumulation + f32 softmax.
    out_bf16 = jax.block_until_ready(
        neighbor_aggregation(query, key_t, q_w, k_w, v_w,
                             mxu_dtype=jnp.bfloat16))
    assert out_bf16.shape == (B, Lq, H)
    assert jnp.allclose(out_bf16, ref, atol=1e-1, rtol=1e-1)

    print("KERNEL_OK")
</pallas_src>

<mosaic_0001>
module attributes {stable_mosaic.version = 11 : i64} {
  func.func @_neighbor_agg_kernel(%arg0: i32, %arg1: memref<8x8x32xf32, #tpu.memory_space<vmem>>, %arg2: memref<8x32x32xf32, #tpu.memory_space<vmem>>, %arg3: memref<32x32xf32, #tpu.memory_space<vmem>>, %arg4: memref<32x32xf32, #tpu.memory_space<vmem>>, %arg5: memref<32x32xf32, #tpu.memory_space<vmem>>, %arg6: memref<8x8x32xf32, #tpu.memory_space<vmem>>) attributes {dimension_semantics = [#tpu.dimension_semantics<parallel>], iteration_bounds = array<i64: 1>, scalar_prefetch = 0 : i64, scratch_operands = 0 : i64, tpu.core_type = #tpu.core_type<tc>, window_params = [{transform_indices = @transform_0, window_bounds = array<i64: 8, 8, 32>}, {transform_indices = @transform_1, window_bounds = array<i64: 8, 32, 32>}, {pipeline_mode = #tpu.pipeline_mode<synchronous>, transform_indices = @transform_2, window_bounds = array<i64: 32, 32>}, {pipeline_mode = #tpu.pipeline_mode<synchronous>, transform_indices = @transform_3, window_bounds = array<i64: 32, 32>}, {pipeline_mode = #tpu.pipeline_mode<synchronous>, transform_indices = @transform_4, window_bounds = array<i64: 32, 32>}, {transform_indices = @transform_5, window_bounds = array<i64: 8, 8, 32>}]} {
    %c0 = arith.constant 0 : index
    %c0_0 = arith.constant 0 : index
    %c0_1 = arith.constant 0 : index
    %0 = vector.load %arg1[%c0, %c0_0, %c0_1] : memref<8x8x32xf32, #tpu.memory_space<vmem>>, vector<8x8x32xf32>
    %1 = vector.shape_cast %0 : vector<8x8x32xf32> to vector<64x32xf32>
    %c0_2 = arith.constant 0 : index
    %c0_3 = arith.constant 0 : index
    %c0_4 = arith.constant 0 : index
    %2 = vector.load %arg2[%c0_2, %c0_3, %c0_4] : memref<8x32x32xf32, #tpu.memory_space<vmem>>, vector<8x32x32xf32>
    %3 = vector.shape_cast %2 : vector<8x32x32xf32> to vector<256x32xf32>
    %c0_5 = arith.constant 0 : index
    %c0_6 = arith.constant 0 : index
    %4 = vector.load %arg3[%c0_5, %c0_6] : memref<32x32xf32, #tpu.memory_space<vmem>>, vector<32x32xf32>
    %c0_7 = arith.constant 0 : index
    %c0_8 = arith.constant 0 : index
    %5 = vector.load %arg4[%c0_7, %c0_8] : memref<32x32xf32, #tpu.memory_space<vmem>>, vector<32x32xf32>
    %c0_9 = arith.constant 0 : index
    %c0_10 = arith.constant 0 : index
    %6 = vector.load %arg5[%c0_9, %c0_10] : memref<32x32xf32, #tpu.memory_space<vmem>>, vector<32x32xf32>
    %cst = arith.constant dense<0.000000e+00> : vector<64x32xf32>
    %7 = tpu.matmul %1, %4, %cst {dimension_numbers = #tpu.dot_dimension_numbers<[1], [0], [0], [1], [0, 0, 1, 1], [], []>} : vector<64x32xf32>, vector<32x32xf32>, vector<64x32xf32> -> vector<64x32xf32>
    %8 = vector.shape_cast %7 : vector<64x32xf32> to vector<8x8x32xf32>
    %cst_11 = arith.constant dense<0.000000e+00> : vector<64x32xf32>
    %9 = tpu.matmul %1, %6, %cst_11 {dimension_numbers = #tpu.dot_dimension_numbers<[1], [0], [0], [1], [0, 0, 1, 1], [], []>} : vector<64x32xf32>, vector<32x32xf32>, vector<64x32xf32> -> vector<64x32xf32>
    %10 = vector.shape_cast %9 : vector<64x32xf32> to vector<8x8x32xf32>
    %cst_12 = arith.constant dense<0.000000e+00> : vector<256x32xf32>
    %11 = tpu.matmul %3, %5, %cst_12 {dimension_numbers = #tpu.dot_dimension_numbers<[1], [0], [0], [1], [0, 0, 1, 1], [], []>} : vector<256x32xf32>, vector<32x32xf32>, vector<256x32xf32> -> vector<256x32xf32>
    %12 = vector.shape_cast %11 : vector<256x32xf32> to vector<8x32x32xf32>
    %cst_13 = arith.constant dense<0.000000e+00> : vector<8x8x32xf32>
    %13 = tpu.matmul %8, %12, %cst_13 {dimension_numbers = #tpu.dot_dimension_numbers<[2], [2], [1], [1], [0, 0, 0, 1, 1, 1], [0], [0]>} : vector<8x8x32xf32>, vector<8x32x32xf32>, vector<8x8x32xf32> -> vector<8x8x32xf32>
    %cst_14 = arith.constant dense<0xFF800000> : vector<8x8xf32>
    %14 = vector.multi_reduction <maximumf>, %13, %cst_14 [2] : vector<8x8x32xf32> to vector<8x8xf32>
    %15 = vector.shape_cast %14 : vector<8x8xf32> to vector<8x8x1xf32>
    %16 = vector.broadcast %15 : vector<8x8x1xf32> to vector<8x8x32xf32>
    %17 = arith.subf %13, %16 : vector<8x8x32xf32>
    %18 = math.exp %17 : vector<8x8x32xf32>
    %cst_15 = arith.constant dense<0.000000e+00> : vector<8x8xf32>
    %19 = vector.multi_reduction <add>, %18, %cst_15 [2] : vector<8x8x32xf32> to vector<8x8xf32>
    %20 = vector.shape_cast %19 : vector<8x8xf32> to vector<8x8x1xf32>
    %21 = tpu.reciprocal %20 : vector<8x8x1xf32> -> vector<8x8x1xf32>
    %22 = vector.broadcast %21 : vector<8x8x1xf32> to vector<8x8x32xf32>
    %23 = arith.mulf %18, %22 : vector<8x8x32xf32>
    %24 = arith.mulf %10, %23 : vector<8x8x32xf32>
    %c0_16 = arith.constant 0 : index
    %c0_17 = arith.constant 0 : index
    %c0_18 = arith.constant 0 : index
    %25 = vector.load %arg6[%c0_16, %c0_17, %c0_18] : memref<8x8x32xf32, #tpu.memory_space<vmem>>, vector<8x8x32xf32>
    tpu.vector_store %arg6[%c0_16, %c0_17, %c0_18], %24 {strides = array<i32>} : memref<8x8x32xf32, #tpu.memory_space<vmem>>, vector<8x8x32xf32>,
    return
  }
  func.func @transform_0(%arg0: i32) -> (i32, i32, i32) {
    %c0_i32 = arith.constant 0 : i32
    %c0_i32_0 = arith.constant 0 : i32
    %c0_i32_1 = arith.constant 0 : i32
    return %arg0, %c0_i32, %c0_i32_0 : i32, i32, i32
  }
  func.func @transform_1(%arg0: i32) -> (i32, i32, i32) {
    %c0_i32 = arith.constant 0 : i32
    %c0_i32_0 = arith.constant 0 : i32
    %c0_i32_1 = arith.constant 0 : i32
    return %arg0, %c0_i32, %c0_i32_0 : i32, i32, i32
  }
  func.func @transform_2(%arg0: i32) -> (i32, i32) {
    %c0_i32 = arith.constant 0 : i32
    %c0_i32_0 = arith.constant 0 : i32
    %c0_i32_1 = arith.constant 0 : i32
    return %c0_i32, %c0_i32_0 : i32, i32
  }
  func.func @transform_3(%arg0: i32) -> (i32, i32) {
    %c0_i32 = arith.constant 0 : i32
    %c0_i32_0 = arith.constant 0 : i32
    %c0_i32_1 = arith.constant 0 : i32
    return %c0_i32, %c0_i32_0 : i32, i32
  }
  func.func @transform_4(%arg0: i32) -> (i32, i32) {
    %c0_i32 = arith.constant 0 : i32
    %c0_i32_0 = arith.constant 0 : i32
    %c0_i32_1 = arith.constant 0 : i32
    return %c0_i32, %c0_i32_0 : i32, i32
  }
  func.func @transform_5(%arg0: i32) -> (i32, i32, i32) {
    %c0_i32 = arith.constant 0 : i32
    %c0_i32_0 = arith.constant 0 : i32
    %c0_i32_1 = arith.constant 0 : i32
    return %arg0, %c0_i32, %c0_i32_0 : i32, i32, i32
  }
}

</mosaic_0001>

<bundles_post_ra>
// kernel: tpu_custom_call.1
= control target key start
LH: loop header
LB: loop body
LE: loop exit
PB: predicated region body
PF: predicated region fallthrough
CT: control target
= control target key end

     0   :  { %10 = vsyncpa [#allocation3], 0  ;;  %s2348_s0 = inlined_call_operand.hbm [shape: f32[8,8,32], index: 0, kind: input, shape index: {}]   ;;  %s2349_s1 = inlined_call_operand.hbm [shape: f32[8,32,32], index: 1, kind: input, shape index: {}]   ;;  %s2350_s2 = inlined_call_operand.hbm [shape: f32[32,32], index: 2, kind: input, shape index: {}]   ;;  %s2351_s3 = inlined_call_operand.hbm [shape: f32[32,32], index: 3, kind: input, shape index: {}]   ;;  %s2352_s4 = inlined_call_operand.hbm [shape: f32[32,32], index: 4, kind: input, shape index: {}]   ;;  %s2353_s5 = inlined_call_operand.hbm [shape: f32[8,8,32], index: 5, kind: output, shape index: {}]  }
   0x1   :  { %11 = vsyncpa [#allocation6], 0 }
   0x2   :  { %12 = vsyncpa [#allocation9], 0 }
   0x3   :  { %13 = vsyncpa [#allocation4], 0  ;;  %s2042_s18 = smov [#allocation5]   ;;  %s2043_s20 = smov [#allocation8]  }
   0x4   :  { %s31_s19 = sshll.u32 %s2042_s18, 4  ;;  %s55_s21 = sshll.u32 %s2043_s20, 4  ;;  %s32_s19 = int_to_ptr.vmem [resolvable:$true] %s31_s19  ;;  %s56_s21 = int_to_ptr.vmem [resolvable:$true] %s55_s21 }
   0x5   :  { %s1922_s22 = scalar_lea.vmem %s32_s19, 4096  ;;  %p1927_p1 = scmp.lt.s32.totalorder %s32_s19, %s32_s19 }
   0x6   :  { %p1923_p0 = scmp.ne.s32.totalorder %s32_s19, %s1922_s22  ;;  %p1928_p2 = scmp.lt.s32.totalorder %s1922_s22, %s1922_s22 }
   0x8   :  { %p1929_p3 = por %p1928_p2, %p1927_p1 }
   0xa   :  { %p1930_p4 = pnand %p1929_p3, %p1923_p0 }
   0xc   :  { %1933 = shalt.err (!%p1930_p4)
}
   0xd   :  { %s2044_s23 = smov 128   ;;  %s2045_s24 = smov 8  }
   0xe   :  { %37 = dma.hbm_to_vmem [thread:$0]  %s2349_s1, 4096, %s32_s19, [#allocation6], %s2044_s23, %s2044_s23, %s2045_s24  }
   0xf   :  { %s1942_s27 = scalar_lea.vmem %s56_s21, 512  ;;  %p1947_p6 = scmp.lt.s32.totalorder %s56_s21, %s56_s21 }
  0x10   :  { %p1943_p5 = scmp.ne.s32.totalorder %s56_s21, %s1942_s27  ;;  %p1948_p7 = scmp.lt.s32.totalorder %s1942_s27, %s1942_s27 }
  0x12   :  { %p1949_p8 = por %p1948_p7, %p1947_p6 }
  0x14   :  { %p1950_p9 = pnand %p1949_p8, %p1943_p5 }
  0x16   :  { %1953 = shalt.err (!%p1950_p9)
}
  0x17   :  { %61 = dma.hbm_to_vmem [thread:$0]  %s2351_s3, 512, %s56_s21, [#allocation9], %s2044_s23, %s2044_s23, %s2045_s24  }
  0x18   :  { %s2046_s30 = smov [#allocation2]   ;;  %s2047_s7 = smov [#allocation7]  }
  0x19   :  { %s19_s6 = sshll.u32 %s2046_s30, 4  ;;  %s43_s8 = sshll.u32 %s2047_s7, 4  ;;  %s20_s6 = int_to_ptr.vmem [resolvable:$true] %s19_s6  ;;  %s44_s8 = int_to_ptr.vmem [resolvable:$true] %s43_s8 }
  0x1a   :  { %s1962_s1 = scalar_lea.vmem %s20_s6, 1024  ;;  %p1967_p11 = scmp.lt.s32.totalorder %s20_s6, %s20_s6 }
  0x1b   :  { %p1963_p10 = scmp.ne.s32.totalorder %s20_s6, %s1962_s1  ;;  %p1968_p12 = scmp.lt.s32.totalorder %s1962_s1, %s1962_s1 }
  0x1d   :  { %p1969_p13 = por %p1968_p12, %p1967_p11 }
  0x1f   :  { %p1970_p0 = pnand %p1969_p13, %p1963_p10 }
  0x21   :  { %1973 = shalt.err (!%p1970_p0)
}
  0x22   :  { %25 = dma.hbm_to_vmem [thread:$0]  %s2348_s0, 1024, %s20_s6, [#allocation3], %s2044_s23, %s2044_s23, %s2045_s24  }
  0x23   :  { %s1982_s3 = scalar_lea.vmem %s44_s8, 512  ;;  %p1987_p2 = scmp.lt.s32.totalorder %s44_s8, %s44_s8 }
  0x24   :  { %p1983_p1 = scmp.ne.s32.totalorder %s44_s8, %s1982_s3  ;;  %p1988_p3 = scmp.lt.s32.totalorder %s1982_s3, %s1982_s3 }
  0x26   :  { %p1989_p4 = por %p1988_p3, %p1987_p2 }
  0x28   :  { %p1990_p5 = pnand %p1989_p4, %p1983_p1 }
  0x2a   :  { %1993 = shalt.err (!%p1990_p5)
}
  0x2b   :  { %49 = dma.hbm_to_vmem [thread:$0]  %s2350_s2, 512, %s44_s8, [#allocation6], %s2044_s23, %s2044_s23, %s2045_s24  }
  0x2c   :  { %s2048_s13 = smov [#allocation10]  }
  0x2d   :  { %s67_s14 = sshll.u32 %s2048_s13, 4  ;;  %s68_s14 = int_to_ptr.vmem [resolvable:$true] %s67_s14 }
  0x2e   :  { %s2002_s15 = scalar_lea.vmem %s68_s14, 512  ;;  %p2007_p7 = scmp.lt.s32.totalorder %s68_s14, %s68_s14 }
  0x2f   :  { %p2003_p6 = scmp.ne.s32.totalorder %s68_s14, %s2002_s15  ;;  %p2008_p8 = scmp.lt.s32.totalorder %s2002_s15, %s2002_s15 }
  0x31   :  { %p2009_p9 = por %p2008_p8, %p2007_p7 }
  0x33   :  { %p2010_p10 = pnand %p2009_p9, %p2003_p6 }
  0x35   :  { %2013 = shalt.err (!%p2010_p10)
}
  0x36   :  { %73 = dma.hbm_to_vmem [thread:$0]  %s2352_s4, 512, %s68_s14, [#allocation9], %s2044_s23, %s2044_s23, %s2045_s24  }
  0x37   :  { %2034 = dma.done.wait [#allocation3], 1024  }
  0x38   :  { %2035 = vsyncadd [#allocation3], 4294966272 }
  0x39   :  { %2036 = dma.done.wait [#allocation6], 4608  }
  0x3a   :  { %2037 = vsyncadd [#allocation6], 4294962688 }
  0x3b   :  { %2038 = dma.done.wait [#allocation9], 1024  }
  0x3c   :  { %2039 = vsyncadd [#allocation9], 4294966272  ;;  %vm141_vm0 = vcmask 261120   ;;  %v132_v0 = vld [vmem:[#allocation7 + $0x18] sm:$0xff]  ;;  %v131_v1 = vld [vmem:[#allocation7 + $0x10] sm:$0xff]  ;;  %v2049_v52 = vmov 0.0  }
  0x3d   :  { %1688 = vmatprep.subr.mxu0 %v132_v0  ;;  %v89_v2 = vld [vmem:[#allocation2] sm:$0xff]  ;;  %v130_v3 = vld [vmem:[#allocation7 + $0x8] sm:$0xff]  ;;  %v136_v6 = vld [vmem:[#allocation8 + $0x18] sm:$0xff]  ;;  %vm2050_vm1 = vmmov 0   ;;  %s2051_s2 = smov [#allocation11]  }
  0x3e   :  { %1689 = vmatpush3.msra.mxu0 %v132_v0  ;;  %1696 = vmatprep.mubr.msk.f32.mxu0 %vm141_vm0, %v89_v2  ;;  %v129_v4 = vld [vmem:[#allocation7] sm:$0xff]  ;;  %v2114_v5 = vld [vmem:[#allocation2 + $0x8] sm:$0xff]  ;;  %v2116_v7 = vld [vmem:[#allocation2 + $0x10] sm:$0xff]  ;;  %s1486_s4 = sshll.u32 %s2051_s2, 4  ;;  %s1487_s4 = int_to_ptr.vmem [resolvable:$true] %s1486_s4 }
  0x3f   :  { %1690 = vmatprep.subr.mxu0 %v131_v1  ;;  %1716 = vmatprep.mubr.msk.f32.mxu1 %vm141_vm0, %v89_v2  ;;  %v135_v8 = vld [vmem:[#allocation8 + $0x10] sm:$0xff]  ;;  %v2122_v9 = vld [vmem:[#allocation2 + $0x18] sm:$0xff]  ;;  %v134_v10 = vld [vmem:[#allocation8 + $0x8] sm:$0xff]  ;;  %s2014_s17 = scalar_lea.vmem %s1487_s4, 1024  ;;  %p2019_p12 = scmp.lt.s32.totalorder %s1487_s4, %s1487_s4 }
  0x40   :  { %1691 = vmatpush3.msra.mxu0 %v131_v1  ;;  %v2124_v11 = vld [vmem:[#allocation2 + $0x20] sm:$0xff]  ;;  %v2130_v13 = vld [vmem:[#allocation2 + $0x28] sm:$0xff]  ;;  %v2132_v14 = vld [vmem:[#allocation2 + $0x30] sm:$0xff]  ;;  %p2015_p11 = scmp.ne.s32.totalorder %s1487_s4, %s2014_s17  ;;  %p2020_p13 = scmp.lt.s32.totalorder %s2014_s17, %s2014_s17 }
  0x41   :  { %1692 = vmatprep.subr.mxu0 %v130_v3  ;;  %v133_v12 = vld [vmem:[#allocation8] sm:$0xff]  ;;  %v2138_v15 = vld [vmem:[#allocation2 + $0x38] sm:$0xff]  ;;  %v98_v17 = vld [vmem:[#allocation5 + $0x8] sm:$0xff] }
  0x42   :  { %1693 = vmatpush3.msra.mxu0 %v130_v3  ;;  %v97_v16 = vld [vmem:[#allocation5] sm:$0xff]  ;;  %v99_v18 = vld [vmem:[#allocation5 + $0x10] sm:$0xff]  ;;  %v100_v19 = vld [vmem:[#allocation5 + $0x18] sm:$0xff]  ;;  %p2021_p0 = por %p2020_p13, %p2019_p12 }
  0x43   :  { %1694 = vmatprep.subr.mxu0 %v129_v4  ;;  %v101_v20 = vld [vmem:[#allocation5 + $0x20] sm:$0xff]  ;;  %v102_v21 = vld [vmem:[#allocation5 + $0x28] sm:$0xff]  ;;  %v103_v22 = vld [vmem:[#allocation5 + $0x30] sm:$0xff] }
  0x44   :  { %1695 = vmatpush3.msra.mxu0 %v129_v4  ;;  %v104_v23 = vld [vmem:[#allocation5 + $0x38] sm:$0xff]  ;;  %v105_v24 = vld [vmem:[#allocation5 + $0x40] sm:$0xff]  ;;  %v106_v25 = vld [vmem:[#allocation5 + $0x48] sm:$0xff]  ;;  %p2022_p1 = pnand %p2021_p0, %p2015_p11 }
  0x45   :  { %1697 = vmatmul.mubr.msk.f32.vlgmr.msra.gmra.mxu0 %vm141_vm0, %v2114_v5  ;;  %1728 = vmatprep.subr.mxu0 %v136_v6  ;;  %v107_v26 = vld [vmem:[#allocation5 + $0x50] sm:$0xff]  ;;  %v108_v27 = vld [vmem:[#allocation5 + $0x58] sm:$0xff]  ;;  %v109_v28 = vld [vmem:[#allocation5 + $0x60] sm:$0xff] }
  0x46   :  { %1699 = vmatprep.mubr.msk.f32.mxu0 %vm141_vm0, %v2116_v7  ;;  %1729 = vmatpush3.msra.mxu0 %v136_v6  ;;  %v110_v29 = vld [vmem:[#allocation5 + $0x68] sm:$0xff]  ;;  %v111_v30 = vld [vmem:[#allocation5 + $0x70] sm:$0xff]  ;;  %v112_v31 = vld [vmem:[#allocation5 + $0x78] sm:$0xff] }
  0x47   :  { %1730 = vmatprep.subr.mxu0 %v135_v8  ;;  %v113_v32 = vld [vmem:[#allocation5 + $0x80] sm:$0xff]  ;;  %v114_v33 = vld [vmem:[#allocation5 + $0x88] sm:$0xff]  ;;  %v115_v34 = vld [vmem:[#allocation5 + $0x90] sm:$0xff] }
  0x48   :  { %1731 = vmatpush3.msra.mxu0 %v135_v8  ;;  %v116_v35 = vld [vmem:[#allocation5 + $0x98] sm:$0xff]  ;;  %v117_v36 = vld [vmem:[#allocation5 + $0xa0] sm:$0xff]  ;;  %v118_v37 = vld [vmem:[#allocation5 + $0xa8] sm:$0xff] }
  0x49   :  { %1700 = vmatmul.mubr.msk.f32.gmra.mxu0 %vm141_vm0, %v2122_v9  ;;  %1732 = vmatprep.subr.mxu0 %v134_v10  ;;  %v119_v38 = vld [vmem:[#allocation5 + $0xb0] sm:$0xff]  ;;  %v120_v39 = vld [vmem:[#allocation5 + $0xb8] sm:$0xff]  ;;  %v121_v40 = vld [vmem:[#allocation5 + $0xc0] sm:$0xff] }
  0x4a   :  { %1702 = vmatprep.mubr.msk.f32.mxu0 %vm141_vm0, %v2124_v11  ;;  %1733 = vmatpush3.msra.mxu0 %v134_v10  ;;  %v122_v41 = vld [vmem:[#allocation5 + $0xc8] sm:$0xff]  ;;  %v123_v42 = vld [vmem:[#allocation5 + $0xd0] sm:$0xff]  ;;  %v124_v43 = vld [vmem:[#allocation5 + $0xd8] sm:$0xff] }
  0x4b   :  { %1734 = vmatprep.subr.mxu0 %v133_v12  ;;  %v125_v44 = vld [vmem:[#allocation5 + $0xe0] sm:$0xff]  ;;  %v126_v45 = vld [vmem:[#allocation5 + $0xe8] sm:$0xff]  ;;  %v127_v46 = vld [vmem:[#allocation5 + $0xf0] sm:$0xff] }
  0x4c   :  { %1735 = vmatpush3.msra.mxu0 %v133_v12  ;;  %v128_v47 = vld [vmem:[#allocation5 + $0xf8] sm:$0xff]  ;;  %v139_v49 = vld [vmem:[#allocation10 + $0x10] sm:$0xff]  ;;  %v138_v50 = vld [vmem:[#allocation10 + $0x8] sm:$0xff] }
  0x4d   :  { %1703 = vmatmul.mubr.msk.f32.gmra.mxu0 %vm141_vm0, %v2130_v13  ;;  %v140_v48 = vld [vmem:[#allocation10 + $0x18] sm:$0xff]  ;;  %v137_v51 = vld [vmem:[#allocation10] sm:$0xff]  ;;  %1828 = vmatprep.subr.mxu0 %v2049_v52 }
  0x4e   :  { %1705 = vmatprep.mubr.msk.f32.mxu0 %vm141_vm0, %v2132_v14  ;;  %1708 = vmatprep.subr.mxu1 %v140_v48 }
  0x4f   :  { %1709 = vmatpush3.msra.mxu1 %v140_v48 }
  0x50   :  { %1710 = vmatprep.subr.mxu1 %v139_v49 }
  0x51   :  { %1706 = vmatmul.mubr.msk.f32.gmra.mxu0 %vm141_vm0, %v2138_v15  ;;  %1711 = vmatpush3.msra.mxu1 %v139_v49 }
  0x52   :  { %1736 = vmatprep.mubr.msk.f32.mxu0 %vm141_vm0, %v97_v16  ;;  %1712 = vmatprep.subr.mxu1 %v138_v50 }
  0x53   :  { %1713 = vmatpush3.msra.mxu1 %v138_v50 }
  0x54   :  { %1714 = vmatprep.subr.mxu1 %v137_v51 }
  0x55   :  { %1737 = vmatmul.mubr.msk.f32.vlgmr.msra.gmra.mxu0 %vm141_vm0, %v98_v17  ;;  %1715 = vmatpush3.msra.mxu1 %v137_v51 }
  0x56   :  { %1739 = vmatprep.mubr.msk.f32.mxu0 %vm141_vm0, %v99_v18  ;;  %1717 = vmatmul.mubr.msk.f32.vlgmr.msra.gmra.mxu1 %vm141_vm0, %v2114_v5 }
  0x57   :  { %1784 = vmatprep.subr.mxu1 %v2049_v52  ;;  %1719 = vmatprep.mubr.msk.f32.mxu1 %vm141_vm0, %v2116_v7 }
  0x59   :  { %1740 = vmatmul.mubr.msk.f32.gmra.mxu0 %vm141_vm0, %v100_v19 }
  0x5a   :  { %1742 = vmatprep.mubr.msk.f32.mxu0 %vm141_vm0, %v101_v20  ;;  %1720 = vmatmul.mubr.msk.f32.gmra.mxu1 %vm141_vm0, %v2122_v9 }
  0x5b   :  { %1722 = vmatprep.mubr.msk.f32.mxu1 %vm141_vm0, %v2124_v11 }
  0x5d   :  { %1743 = vmatmul.mubr.msk.f32.gmra.mxu0 %vm141_vm0, %v102_v21 }
  0x5e   :  { %1745 = vmatprep.mubr.msk.f32.mxu0 %vm141_vm0, %v103_v22  ;;  %1723 = vmatmul.mubr.msk.f32.gmra.mxu1 %vm141_vm0, %v2130_v13 }
  0x5f   :  { %1725 = vmatprep.mubr.msk.f32.mxu1 %vm141_vm0, %v2132_v14 }
  0x61   :  { %1746 = vmatmul.mubr.msk.f32.gmra.mxu0 %vm141_vm0, %v104_v23 }
  0x62   :  { %1748 = vmatprep.mubr.msk.f32.mxu0 %vm141_vm0, %v105_v24  ;;  %1726 = vmatmul.mubr.msk.f32.gmra.mxu1 %vm141_vm0, %v2138_v15 }
  0x63   :  { %1792 = vmatprep.mubr.msk.f32.mxu1 %vm2050_vm1, %v2049_v52 }
  0x65   :  { %1749 = vmatmul.mubr.msk.f32.gmra.mxu0 %vm141_vm0, %v106_v25 }
  0x66   :  { %1751 = vmatprep.mubr.msk.f32.mxu0 %vm141_vm0, %v107_v26 }
  0x69   :  { %1752 = vmatmul.mubr.msk.f32.gmra.mxu0 %vm141_vm0, %v108_v27 }
  0x6a   :  { %1754 = vmatprep.mubr.msk.f32.mxu0 %vm141_vm0, %v109_v28 }
  0x6d   :  { %1755 = vmatmul.mubr.msk.f32.gmra.mxu0 %vm141_vm0, %v110_v29 }
  0x6e   :  { %1757 = vmatprep.mubr.msk.f32.mxu0 %vm141_vm0, %v111_v30 }
  0x71   :  { %1758 = vmatmul.mubr.msk.f32.gmra.mxu0 %vm141_vm0, %v112_v31 }
  0x72   :  { %1760 = vmatprep.mubr.msk.f32.mxu0 %vm141_vm0, %v113_v32 }
  0x75   :  { %1761 = vmatmul.mubr.msk.f32.gmra.mxu0 %vm141_vm0, %v114_v33 }
  0x76   :  { %1763 = vmatprep.mubr.msk.f32.mxu0 %vm141_vm0, %v115_v34 }
  0x79   :  { %1764 = vmatmul.mubr.msk.f32.gmra.mxu0 %vm141_vm0, %v116_v35 }
  0x7a   :  { %1766 = vmatprep.mubr.msk.f32.mxu0 %vm141_vm0, %v117_v36 }
  0x7d   :  { %1767 = vmatmul.mubr.msk.f32.gmra.mxu0 %vm141_vm0, %v118_v37 }
  0x7e   :  { %1769 = vmatprep.mubr.msk.f32.mxu0 %vm141_vm0, %v119_v38 }
  0x81   :  { %1770 = vmatmul.mubr.msk.f32.gmra.mxu0 %vm141_vm0, %v120_v39 }
  0x82   :  { %1772 = vmatprep.mubr.msk.f32.mxu0 %vm141_vm0, %v121_v40 }
  0x85   :  { %1773 = vmatmul.mubr.msk.f32.gmra.mxu0 %vm141_vm0, %v122_v41 }
  0x86   :  { %1775 = vmatprep.mubr.msk.f32.mxu0 %vm141_vm0, %v123_v42 }
  0x89   :  { %1776 = vmatmul.mubr.msk.f32.gmra.mxu0 %vm141_vm0, %v124_v43 }
  0x8a   :  { %1778 = vmatprep.mubr.msk.f32.mxu0 %vm141_vm0, %v125_v44 }
  0x8d   :  { %1779 = vmatmul.mubr.msk.f32.gmra.mxu0 %vm141_vm0, %v126_v45 }
  0x8e   :  { %1781 = vmatprep.mubr.msk.f32.mxu0 %vm141_vm0, %v127_v46 }
  0x91   :  { %1782 = vmatmul.mubr.msk.f32.gmra.mxu0 %vm141_vm0, %v128_v47 }
  0x92   :  { %1836 = vmatprep.mubr.msk.f32.mxu0 %vm2050_vm1, %v2049_v52 }
 0x105   :  { %v1698_v53 = vpop.f32.mrf.mxu0 }
 0x107   :  { %v232_v54 = vpop.f32.mrf.mxu0 }
 0x109   :  { %v2194_v55 = vpop.f32.mrf.mxu0 }
 0x10b   :  { %v2196_v56 = vpop.f32.mrf.mxu0 }
 0x10d   :  { %v2198_v57 = vpop.f32.mrf.mxu0 }
 0x10f   :  { %v2200_v58 = vpop.f32.mrf.mxu0 }
 0x111   :  { %v2202_v59 = vpop.f32.mrf.mxu0 }
 0x113   :  { %v2204_v60 = vpop.f32.mrf.mxu0 }
 0x115   :  { %v1738_v61 = vpop.f32.mrf.mxu0 }
 0x116   :  { %v2294_v29 = vpop.f32.mrf.mxu1 }
 0x117   :  { %v538_v62 = vpop.f32.mrf.mxu0 }
 0x118   :  { %v2296_v30 = vpop.f32.mrf.mxu1 }
 0x119   :  { %v1741_v63 = vpop.f32.mrf.mxu0 }
 0x11a   :  { %1785 = vmatpush3.xpose.msk.msra.mxu1 %vm141_vm0, %v1741_v63  ;;  %v2298_v31 = vpop.f32.mrf.mxu1 }
 0x11b   :  { %v548_v0 = vpop.f32.mrf.mxu0  ;;  %1786 = vmatprep.subr.mxu1 %v2049_v52 }
 0x11c   :  { %v2300_v32 = vpop.f32.mrf.mxu1 }
 0x11d   :  { %v1744_v1 = vpop.f32.mrf.mxu0 }
 0x11e   :  { %1787 = vmatpush3.xpose.msk.msra.mxu1 %vm141_vm0, %v548_v0  ;;  %v2302_v33 = vpop.f32.mrf.mxu1 }
 0x11f   :  { %v558_v2 = vpop.f32.mrf.mxu0  ;;  %1788 = vmatprep.subr.mxu1 %v2049_v52 }
 0x120   :  { %v2304_v34 = vpop.f32.mrf.mxu1 }
 0x121   :  { %v1747_v3 = vpop.f32.mrf.mxu0 }
 0x122   :  { %1789 = vmatpush3.xpose.msk.msra.mxu1 %vm141_vm0, %v1738_v61  ;;  %v2306_v35 = vpop.f32.mrf.mxu1 }
 0x123   :  { %v568_v4 = vpop.f32.mrf.mxu0  ;;  %1790 = vmatprep.subr.mxu1 %v2049_v52 }
 0x124   :  { %v2308_v36 = vpop.f32.mrf.mxu1 }
 0x125   :  { %v1750_v5 = vpop.f32.mrf.mxu0 }
 0x126   :  { %1791 = vmatpush3.xpose.msk.msra.mxu1 %vm141_vm0, %v538_v62 }
 0x127   :  { %v578_v6 = vpop.f32.mrf.mxu0  ;;  %1795 = vmatprep.subr.mxu1 %v2049_v52 }
 0x129   :  { %v1753_v7 = vpop.f32.mrf.mxu0  ;;  %1793 = vmatmul.mubr.msk.f32.vlgmr.msra.gmra.mxu1 %vm141_vm0, %v232_v54 }
 0x12a   :  { %1796 = vmatpush3.xpose.msk.msra.mxu1 %vm141_vm0, %v1747_v3  ;;  %1803 = vmatprep.mubr.msk.f32.mxu1 %vm2050_vm1, %v2049_v52 }
 0x12b   :  { %v588_v8 = vpop.f32.mrf.mxu0  ;;  %1797 = vmatprep.subr.mxu1 %v2049_v52 }
 0x12d   :  { %v1756_v9 = vpop.f32.mrf.mxu0 }
 0x12e   :  { %1798 = vmatpush3.xpose.msk.msra.mxu1 %vm141_vm0, %v568_v4 }
 0x12f   :  { %v598_v10 = vpop.f32.mrf.mxu0  ;;  %1799 = vmatprep.subr.mxu1 %v2049_v52 }
 0x131   :  { %v1759_v11 = vpop.f32.mrf.mxu0 }
 0x132   :  { %1800 = vmatpush3.xpose.msk.msra.mxu1 %vm141_vm0, %v1744_v1 }
 0x133   :  { %v608_v12 = vpop.f32.mrf.mxu0  ;;  %1801 = vmatprep.subr.mxu1 %v2049_v52 }
 0x135   :  { %v1762_v13 = vpop.f32.mrf.mxu0 }
 0x136   :  { %1802 = vmatpush3.xpose.msk.msra.mxu1 %vm141_vm0, %v558_v2 }
 0x137   :  { %v618_v14 = vpop.f32.mrf.mxu0  ;;  %1806 = vmatprep.subr.mxu1 %v2049_v52 }
 0x139   :  { %v1765_v15 = vpop.f32.mrf.mxu0  ;;  %1804 = vmatmul.mubr.msk.f32.vlgmr.msra.gmra.mxu1 %vm141_vm0, %v1698_v53 }
 0x13a   :  { %1807 = vmatpush3.xpose.msk.msra.mxu1 %vm141_vm0, %v1753_v7  ;;  %1829 = vmatpush3.xpose.msk.msra.mxu0 %vm141_vm0, %v1765_v15 }
 0x13b   :  { %v628_v16 = vpop.f32.mrf.mxu0  ;;  %1808 = vmatprep.subr.mxu1 %v2049_v52  ;;  %1830 = vmatprep.subr.mxu0 %v2049_v52 }
 0x13c   :  { %1814 = vmatprep.mubr.msk.f32.mxu1 %vm2050_vm1, %v2049_v52 }
 0x13d   :  { %v1768_v17 = vpop.f32.mrf.mxu0 }
 0x13e   :  { %1809 = vmatpush3.xpose.msk.msra.mxu1 %vm141_vm0, %v588_v8  ;;  %1831 = vmatpush3.xpose.msk.msra.mxu0 %vm141_vm0, %v628_v16 }
 0x13f   :  { %v638_v18 = vpop.f32.mrf.mxu0  ;;  %1810 = vmatprep.subr.mxu1 %v2049_v52  ;;  %1832 = vmatprep.subr.mxu0 %v2049_v52 }
 0x141   :  { %v1771_v19 = vpop.f32.mrf.mxu0 }
 0x142   :  { %1811 = vmatpush3.xpose.msk.msra.mxu1 %vm141_vm0, %v1750_v5  ;;  %1833 = vmatpush3.xpose.msk.msra.mxu0 %vm141_vm0, %v1762_v13 }
 0x143   :  { %v648_v20 = vpop.f32.mrf.mxu0  ;;  %1812 = vmatprep.subr.mxu1 %v2049_v52  ;;  %1834 = vmatprep.subr.mxu0 %v2049_v52 }
 0x145   :  { %v1774_v21 = vpop.f32.mrf.mxu0 }
 0x146   :  { %1813 = vmatpush3.xpose.msk.msra.mxu1 %vm141_vm0, %v578_v6  ;;  %1835 = vmatpush3.xpose.msk.msra.mxu0 %vm141_vm0, %v618_v14 }
 0x147   :  { %v658_v22 = vpop.f32.mrf.mxu0  ;;  %1817 = vmatprep.subr.mxu1 %v2049_v52  ;;  %1850 = vmatprep.subr.mxu0 %v2049_v52 }
 0x149   :  { %v1777_v23 = vpop.f32.mrf.mxu0  ;;  %1815 = vmatmul.mubr.msk.f32.vlgmr.msra.gmra.mxu1 %vm141_vm0, %v2196_v56  ;;  %1837 = vmatmul.mubr.msk.f32.vlgmr.msra.gmra.mxu0 %vm141_vm0, %v2200_v58 }
 0x14a   :  { %1818 = vmatpush3.xpose.msk.msra.mxu1 %vm141_vm0, %v1759_v11  ;;  %1851 = vmatpush3.xpose.msk.msra.mxu0 %vm141_vm0, %v1777_v23 }
 0x14b   :  { %v668_v24 = vpop.f32.mrf.mxu0  ;;  %1819 = vmatprep.subr.mxu1 %v2049_v52  ;;  %1852 = vmatprep.subr.mxu0 %v2049_v52 }
 0x14c   :  { %1825 = vmatprep.mubr.msk.f32.mxu1 %vm2050_vm1, %v2049_v52  ;;  %1858 = vmatprep.mubr.msk.f32.mxu0 %vm2050_vm1, %v2049_v52 }
 0x14d   :  { %v1780_v25 = vpop.f32.mrf.mxu0 }
 0x14e   :  { %1820 = vmatpush3.xpose.msk.msra.mxu1 %vm141_vm0, %v608_v12  ;;  %1853 = vmatpush3.xpose.msk.msra.mxu0 %vm141_vm0, %v668_v24 }
 0x14f   :  { %1821 = vmatprep.subr.mxu1 %v2049_v52  ;;  %1854 = vmatprep.subr.mxu0 %v2049_v52  ;;  %v678_v26 = vpop.f32.mrf.mxu0 }
 0x151   :  { %v1783_v27 = vpop.f32.mrf.mxu0 }
 0x152   :  { %1822 = vmatpush3.xpose.msk.msra.mxu1 %vm141_vm0, %v1756_v9  ;;  %1855 = vmatpush3.xpose.msk.msra.mxu0 %vm141_vm0, %v1774_v21 }
 0x153   :  { %1823 = vmatprep.subr.mxu1 %v2049_v52  ;;  %1856 = vmatprep.subr.mxu0 %v2049_v52  ;;  %v688_v28 = vpop.f32.mrf.mxu0 }
 0x156   :  { %1824 = vmatpush3.xpose.msk.msra.mxu1 %vm141_vm0, %v598_v10  ;;  %1857 = vmatpush3.xpose.msk.msra.mxu0 %vm141_vm0, %v658_v22 }
 0x157   :  { %1839 = vmatprep.subr.mxu1 %v2049_v52 }
 0x159   :  { %1826 = vmatmul.mubr.msk.f32.vlgmr.msra.gmra.mxu1 %vm141_vm0, %v2194_v55  ;;  %1859 = vmatmul.mubr.msk.f32.vlgmr.msra.gmra.mxu0 %vm141_vm0, %v2204_v60 }
 0x15a   :  { %1840 = vmatpush3.xpose.msk.msra.mxu1 %vm141_vm0, %v1771_v19  ;;  %1847 = vmatprep.mubr.msk.f32.mxu1 %vm2050_vm1, %v2049_v52 }
 0x15b   :  { %1841 = vmatprep.subr.mxu1 %v2049_v52 }
 0x15e   :  { %1842 = vmatpush3.xpose.msk.msra.mxu1 %vm141_vm0, %v648_v20 }
 0x15f   :  { %1843 = vmatprep.subr.mxu1 %v2049_v52 }
 0x162   :  { %1844 = vmatpush3.xpose.msk.msra.mxu1 %vm141_vm0, %v1768_v17 }
 0x163   :  { %1845 = vmatprep.subr.mxu1 %v2049_v52 }
 0x166   :  { %1846 = vmatpush3.xpose.msk.msra.mxu1 %vm141_vm0, %v638_v18 }
 0x167   :  { %1861 = vmatprep.subr.mxu1 %v2049_v52 }
 0x169   :  { %1848 = vmatmul.mubr.msk.f32.vlgmr.msra.gmra.mxu1 %vm141_vm0, %v2198_v57 }
 0x16a   :  { %1862 = vmatpush3.xpose.msk.msra.mxu1 %vm141_vm0, %v1783_v27  ;;  %1869 = vmatprep.mubr.msk.f32.mxu1 %vm2050_vm1, %v2049_v52 }
 0x16b   :  { %1863 = vmatprep.subr.mxu1 %v2049_v52 }
 0x16e   :  { %1864 = vmatpush3.xpose.msk.msra.mxu1 %vm141_vm0, %v688_v28 }
 0x16f   :  { %1865 = vmatprep.subr.mxu1 %v2049_v52 }
 0x172   :  { %1866 = vmatpush3.xpose.msk.msra.mxu1 %vm141_vm0, %v1780_v25 }
 0x173   :  { %1867 = vmatprep.subr.mxu1 %v2049_v52 }
 0x176   :  { %1868 = vmatpush3.xpose.msk.msra.mxu1 %vm141_vm0, %v678_v26 }
 0x179   :  { %1870 = vmatmul.mubr.msk.f32.vlgmr.msra.gmra.mxu1 %vm141_vm0, %v2202_v59 }
 0x1e9   :  { %v778_v37 = vpop.f32.mrf.mxu1 }
 0x1ea   :  { %v1377_v38 = vsel %vm141_vm0, %v778_v37, -inf }
 0x1eb   :  { %1378 = vmax.xlane.f32.xlu0 %v1377_v38  ;;  %v1794_v39 = vpop.f32.mrf.mxu1 }
 0x1f9   :  { %v863_v40 = vpop.f32.mrf.mxu1 }
 0x1fa   :  { %v1380_v41 = vsel %vm141_vm0, %v863_v40, -inf }
 0x1fb   :  { %1381 = vmax.xlane.f32.xlu0 %v1380_v41  ;;  %v1805_v42 = vpop.f32.mrf.mxu1 }
 0x209   :  { %v948_v43 = vpop.f32.mrf.mxu1  ;;  %v1118_v44 = vpop.f32.mrf.mxu0 }
 0x20a   :  { %v1383_v45 = vsel %vm141_vm0, %v948_v43, -inf  ;;  %v1389_v46 = vsel %vm141_vm0, %v1118_v44, -inf }
 0x20b   :  { %1384 = vmax.xlane.f32.xlu1 %v1383_v45  ;;  %v1816_v47 = vpop.f32.mrf.mxu1  ;;  %1390 = vmax.xlane.f32.xlu0 %v1389_v46  ;;  %v1838_v48 = vpop.f32.mrf.mxu0 }
 0x219   :  { %v1033_v49 = vpop.f32.mrf.mxu1  ;;  %v1288_v50 = vpop.f32.mrf.mxu0 }
 0x21a   :  { %v1386_v51 = vsel %vm141_vm0, %v1033_v49, -inf  ;;  %v1395_v52 = vsel %vm141_vm0, %v1288_v50, -inf }
 0x21b   :  { %1387 = vmax.xlane.f32.xlu1 %v1386_v51  ;;  %v1827_v53 = vpop.f32.mrf.mxu1  ;;  %1396 = vmax.xlane.f32.xlu0 %v1395_v52  ;;  %v1860_v54 = vpop.f32.mrf.mxu0 }
 0x229   :  { %v1203_v55 = vpop.f32.mrf.mxu1 }
 0x22a   :  { %v1392_v56 = vsel %vm141_vm0, %v1203_v55, -inf }
 0x22b   :  { %1393 = vmax.xlane.f32.xlu1 %v1392_v56  ;;  %v1849_v57 = vpop.f32.mrf.mxu1 }
 0x239   :  { %v1373_v58 = vpop.f32.mrf.mxu1 }
 0x23a   :  { %v1398_v59 = vsel %vm141_vm0, %v1373_v58, -inf }
 0x23b   :  { %1399 = vmax.xlane.f32.xlu1 %v1398_v59  ;;  %v1871_v60 = vpop.f32.mrf.mxu1 }
 0x274   :  { %v1379_v61 = vpop.xlane.xlu0 %1378 }
 0x275   :  { %v1401_v62 = vsub.f32 %v778_v37, %v1379_v61 }
 0x277   :  { %v1409_v63 = vmul.f32 1.442695, %v1401_v62 }
 0x279   :  { %1882 = vpow2.f32 %v1409_v63 }
 0x284   :  { %v1382_v0 = vpop.xlane.xlu0 %1381 }
 0x285   :  { %v1402_v1 = vsub.f32 %v863_v40, %v1382_v0 }
 0x286   :  { %v1883_v2 = vpop.eup %1882 }
 0x287   :  { %v1411_v3 = vmul.f32 1.442695, %v1402_v1  ;;  %v1425_v4 = vsel %vm141_vm0, %v1883_v2, 0.0 }
 0x288   :  { %1426 = vadd.xlane.f32.xlu0 %v1425_v4 }
 0x289   :  { %1884 = vpow2.f32 %v1411_v3 }
 0x294   :  { %v1385_v5 = vpop.xlane.xlu1 %1384  ;;  %v1391_v6 = vpop.xlane.xlu0 %1390 }
 0x295   :  { %v1403_v7 = vsub.f32 %v948_v43, %v1385_v5  ;;  %v1405_v8 = vsub.f32 %v1118_v44, %v1391_v6 }
 0x296   :  { %v1885_v9 = vpop.eup %1884 }
 0x297   :  { %v1413_v10 = vmul.f32 1.442695, %v1403_v7  ;;  %v1417_v11 = vmul.f32 1.442695, %v1405_v8  ;;  %v1428_v12 = vsel %vm141_vm0, %v1885_v9, 0.0 }
 0x298   :  { %1429 = vadd.xlane.f32.xlu1 %v1428_v12 }
 0x299   :  { %1886 = vpow2.f32 %v1413_v10 }
 0x29a   :  { %1888 = vpow2.f32 %v1417_v11 }
 0x2a4   :  { %v1388_v13 = vpop.xlane.xlu1 %1387  ;;  %v1397_v14 = vpop.xlane.xlu0 %1396 }
 0x2a5   :  { %v1404_v15 = vsub.f32 %v1033_v49, %v1388_v13  ;;  %v1407_v16 = vsub.f32 %v1288_v50, %v1397_v14 }
 0x2a6   :  { %v1887_v17 = vpop.eup %1886 }
 0x2a7   :  { %v1415_v18 = vmul.f32 1.442695, %v1404_v15  ;;  %v1421_v19 = vmul.f32 1.442695, %v1407_v16  ;;  %v1431_v20 = vsel %vm141_vm0, %v1887_v17, 0.0  ;;  %v1889_v21 = vpop.eup %1888 }
 0x2a8   :  { %1432 = vadd.xlane.f32.xlu0 %v1431_v20  ;;  %v1437_v22 = vsel %vm141_vm0, %v1889_v21, 0.0 }
 0x2a9   :  { %1890 = vpow2.f32 %v1415_v18 }
 0x2aa   :  { %1892 = vpow2.f32 %v1421_v19 }
 0x2ac   :  { %1438 = vadd.xlane.f32.xlu0 %v1437_v22 }
 0x2b4   :  { %v1394_v23 = vpop.xlane.xlu1 %1393 }
 0x2b5   :  { %v1406_v24 = vsub.f32 %v1203_v55, %v1394_v23 }
 0x2b6   :  { %v1891_v25 = vpop.eup %1890 }
 0x2b7   :  { %v1893_v26 = vpop.eup %1892  ;;  %v1419_v27 = vmul.f32 1.442695, %v1406_v24  ;;  %v1434_v28 = vsel %vm141_vm0, %v1891_v25, 0.0 }
 0x2b8   :  { %1435 = vadd.xlane.f32.xlu1 %v1434_v28  ;;  %v1443_v37 = vsel %vm141_vm0, %v1893_v26, 0.0 }
 0x2b9   :  { %1894 = vpow2.f32 %v1419_v27  ;;  %1444 = vadd.xlane.f32.xlu0 %v1443_v37 }
 0x2c4   :  { %v1400_v38 = vpop.xlane.xlu1 %1399 }
 0x2c5   :  { %v1408_v39 = vsub.f32 %v1373_v58, %v1400_v38 }
 0x2c6   :  { %v1895_v40 = vpop.eup %1894 }
 0x2c7   :  { %v1423_v41 = vmul.f32 1.442695, %v1408_v39  ;;  %v1440_v42 = vsel %vm141_vm0, %v1895_v40, 0.0 }
 0x2c8   :  { %1441 = vadd.xlane.f32.xlu1 %v1440_v42 }
 0x2c9   :  { %1896 = vpow2.f32 %v1423_v41 }
 0x2d6   :  { %v1897_v43 = vpop.eup %1896 }
 0x2d7   :  { %v1446_v44 = vsel %vm141_vm0, %v1897_v43, 0.0 }
 0x2d8   :  { %1447 = vadd.xlane.f32.xlu1 %v1446_v44 }
 0x311   :  { %v1427_v45 = vpop.xlane.xlu0 %1426 }
 0x312   :  { %1898 = vrcp.f32 %v1427_v45 }
 0x31f   :  { %v1899_v46 = vpop.eup %1898 }
 0x320   :  { %v1457_v47 = vmul.f32 %v1899_v46, %v1883_v2 }
 0x321   :  { %v1430_v48 = vpop.xlane.xlu1 %1429 }
 0x322   :  { %v1465_v49 = vmul.f32 %v1457_v47, %v2296_v30  ;;  %1900 = vrcp.f32 %v1430_v48 }
 0x324   :  { %1473 = vst.msk [vmem:[#allocation11] sm:$0xff] %vm141_vm0, %v1465_v49 }
 0x32f   :  { %v1901_v50 = vpop.eup %1900 }
 0x330   :  { %v1458_v51 = vmul.f32 %v1901_v50, %v1885_v9 }
 0x331   :  { %v1433_v52 = vpop.xlane.xlu0 %1432 }
 0x332   :  { %v1466_v53 = vmul.f32 %v2294_v29, %v1458_v51  ;;  %1902 = vrcp.f32 %v1433_v52 }
 0x334   :  { %1474 = vst.msk [vmem:[#allocation11 + $0x8] sm:$0xff] %vm141_vm0, %v1466_v53 }
 0x335   :  { %v1439_v54 = vpop.xlane.xlu0 %1438 }
 0x336   :  { %1904 = vrcp.f32 %v1439_v54 }
 0x33f   :  { %v1903_v55 = vpop.eup %1902 }
 0x340   :  { %v1459_v56 = vmul.f32 %v1903_v55, %v1887_v17 }
 0x341   :  { %v1436_v57 = vpop.xlane.xlu1 %1435 }
 0x342   :  { %v1467_v58 = vmul.f32 %v1459_v56, %v2300_v32  ;;  %1906 = vrcp.f32 %v1436_v57  ;;  %v1445_v30 = vpop.xlane.xlu0 %1444 }
 0x343   :  { %v1905_v59 = vpop.eup %1904  ;;  %1908 = vrcp.f32 %v1445_v30 }
 0x344   :  { %1475 = vst.msk [vmem:[#allocation11 + $0x10] sm:$0xff] %vm141_vm0, %v1467_v58  ;;  %v1461_v60 = vmul.f32 %v1905_v59, %v1889_v21 }
 0x346   :  { %v1469_v61 = vmul.f32 %v1461_v60, %v2304_v34 }
 0x348   :  { %1477 = vst.msk [vmem:[#allocation11 + $0x20] sm:$0xff] %vm141_vm0, %v1469_v61 }
 0x34f   :  { %v1907_v29 = vpop.eup %1906 }
 0x350   :  { %v1909_v62 = vpop.eup %1908  ;;  %v1460_v63 = vmul.f32 %v1907_v29, %v1891_v25 }
 0x351   :  { %v1463_v0 = vmul.f32 %v1909_v62, %v1893_v26  ;;  %v1442_v1 = vpop.xlane.xlu1 %1441 }
 0x352   :  { %v1468_v2 = vmul.f32 %v2298_v31, %v1460_v63  ;;  %1910 = vrcp.f32 %v1442_v1 }
 0x353   :  { %v1471_v32 = vmul.f32 %v1463_v0, %v2308_v36 }
 0x354   :  { %1476 = vst.msk [vmem:[#allocation11 + $0x18] sm:$0xff] %vm141_vm0, %v1468_v2 }
 0x355   :  { %1479 = vst.msk [vmem:[#allocation11 + $0x30] sm:$0xff] %vm141_vm0, %v1471_v32 }
 0x35f   :  { %v1911_v3 = vpop.eup %1910 }
 0x360   :  { %v1462_v4 = vmul.f32 %v1911_v3, %v1895_v40 }
 0x361   :  { %v1448_v5 = vpop.xlane.xlu1 %1447 }
 0x362   :  { %v1470_v34 = vmul.f32 %v2302_v33, %v1462_v4  ;;  %1912 = vrcp.f32 %v1448_v5 }
 0x364   :  { %1478 = vst.msk [vmem:[#allocation11 + $0x28] sm:$0xff] %vm141_vm0, %v1470_v34 }
 0x36f   :  { %v1913_v6 = vpop.eup %1912 }
 0x370   :  { %v1464_v7 = vmul.f32 %v1913_v6, %v1897_v43 }
 0x372   :  { %v1472_v31 = vmul.f32 %v2306_v35, %v1464_v7 }
 0x374   :  { %1480 = vst.msk [vmem:[#allocation11 + $0x38] sm:$0xff] %vm141_vm0, %v1472_v31 }
 0x375   :  { %2025 = shalt.err (!%p2022_p1)
}
 0x376   :  { %1492 = dma.vmem_to_hbm [thread:$0]  %s1487_s4, 1024, %s2353_s5, [#allocation4], %s2044_s23, %s2044_s23, %s2045_s24  }
 0x377   :  { %2040 = dma.done.wait [#allocation4], 1024  }
 0x378   :  { %2041 = vsyncadd [#allocation4], 4294966272 }
 0x379   :  { %1496 = vsyncpa [#allocation3], 1 }
 0x37a   :  { %1497 = vsyncpa [#allocation6], 1 }
 0x37b   :  { %1498 = vsyncpa [#allocation9], 1 }
 0x37c   :  { %1499 = vsyncpa [#allocation4], 1 }

</bundles_post_ra>
